<compile_context>
chip_gen: v7x
topology: tpu7x:2x2x1
jax: 0.10.0
libtpu: 0.0.40
codegen_flags: <defaults>
</compile_context>

<pallas_src>
import functools

import jax
import jax.numpy as jnp
from jax import lax
from jax.experimental import pallas as pl
from jax.experimental.pallas import tpu as pltpu


def _round_up(x, m):
    return ((x + m - 1) // m) * m


def _vmem_capacity_bytes():
    """Per-core VMEM capacity; conservative 64 MiB (v7x) if the query fails."""
    try:
        return int(pltpu.get_tpu_info().vmem_capacity_bytes)
    except Exception:
        return 64 * 1024 * 1024


def _vq_kernel(hw, tile_hw, needs_mask,
               x_ref, en2_ref, e2_ref, et_ref,
               q_ref, idx_ref, sqerr_ref, cnt_ref):
    """One (batch b, spatial tile i) grid step.

    x_ref    : (D,  TN) f32  inputs; channels on sublanes, spatial on lanes
    en2_ref  : (Kp, D)  f32  codebook pre-scaled by -2
    e2_ref   : (Kp, 1)  f32  ||e_k||^2 (1e30 sentinel for padded codes)
    et_ref   : (D,  Kp) f32  codebook transposed (unscaled), gather operand
    q_ref    : (D,  TN) f32  quantized output
    idx_ref  : (1,  TN) i32  encoding indices (lane-dense)
    sqerr_ref: (1, 1, 1)     per-tile sum((quant - x)^2)
    cnt_ref  : (1, Kp, 1)    per-tile per-code counts
    """
    x = x_ref[...]
    e2 = e2_ref[...]
    kp = e2.shape[0]

    # dist[k, n] = ||e_k||^2 - 2 e_k . x_n   (per-column ||x_n||^2 dropped:
    # constant per column, argmin unchanged; the -2 is folded into en2).
    xe = lax.dot_general(en2_ref[...], x, (((1,), (0,)), ((), ())),
                         preferred_element_type=jnp.float32)       # (Kp, TN)
    dist = e2 + xe

    # First-minimum argmin over the code (sublane) axis, matching torch/jnp.
    # iota stays a resident (Kp, 1) column; no (Kp, TN) iota materialized.
    min_d = jnp.min(dist, axis=0, keepdims=True)                   # (1,  TN)
    iota_col = lax.broadcasted_iota(jnp.int32, (kp, 1), 0).astype(jnp.float32)
    masked = jnp.where(dist == min_d, iota_col, jnp.float32(kp))   # (Kp, TN)
    idx_f = jnp.min(masked, axis=0, keepdims=True)                 # (1,  TN)
    # int32 indices (int8 would shave ~8% of kernel HBM bytes at D=4; kept
    # int32 for robustness of the 1-sublane narrow store).
    idx_ref[...] = idx_f.astype(jnp.int32)

    # One-hot encodings and quantized vectors (row gather on the MXU - MXU
    # has slack here, VALU/XLU are the contended slots).
    onehot = (iota_col == idx_f).astype(jnp.float32)               # (Kp, TN)
    quant = lax.dot_general(et_ref[...], onehot, (((1,), (0,)), ((), ())),
                            preferred_element_type=jnp.float32)    # (D,  TN)
    q_ref[...] = quant

    diff = quant - x
    if needs_mask:
        # Only compiled in when H*W is not a tile multiple: mask padded lanes
        # out of the statistics (quant/idx for padded lanes are sliced away
        # in the wrapper).
        lane = lax.broadcasted_iota(jnp.int32, (1, tile_hw), 1)
        lane = lane + pl.program_id(1) * tile_hw
        valid = (lane < hw).astype(jnp.float32)                    # (1, TN)
        diff = diff * valid
        onehot = onehot * valid

    # Partial statistics (reduced in the wrapper).  Sum over lanes first:
    # cross-vreg VALU accumulation, then a single final sublane reduce
    # (also better conditioned for large tiles).
    err = jnp.sum(jnp.sum(diff * diff, axis=1, keepdims=True),
                  axis=0, keepdims=True)                           # (1, 1)
    sqerr_ref[...] = err.reshape(1, 1, 1)
    cnt_ref[...] = jnp.sum(onehot, axis=1, keepdims=True).reshape(1, kp, 1)


@functools.partial(jax.jit, static_argnames=("commitment_cost", "tile_hw"))
def vector_quantizer_forward(x_nchw, embedding, *, commitment_cost=0.25,
                             tile_hw=None):
    """Forward pass of VectorQuantizer.

    Args:
      x_nchw:    (B, C, H, W) float32, C == embedding_dim.
      embedding: (num_embeddings, embedding_dim) float32 codebook.
    Returns:
      (loss, quantized NCHW, perplexity, encoding_indices (N, 1) int32)
    """
    B, C, H, W = x_nchw.shape
    K, D = embedding.shape
    assert C == D, "channel dim must equal embedding_dim"
    HW = H * W
    N = B * HW

    # --- codebook prep (tiny, once in the wrapper) --------------------------
    Kp = _round_up(K, 8)
    e_pad = jnp.zeros((Kp, D), jnp.float32).at[:K].set(
        embedding.astype(jnp.float32))
    e2 = jnp.sum(e_pad * e_pad, axis=1, keepdims=True)              # (Kp, 1)
    e2 = jnp.where(jnp.arange(Kp)[:, None] < K, e2, jnp.float32(1e30))
    en2 = -2.0 * e_pad                                              # (Kp, D)
    e_t = jnp.transpose(e_pad)                                      # (D, Kp)

    # --- tile sizing, generation-aware --------------------------------------
    vmem_cap = _vmem_capacity_bytes()
    vmem_limit = int(0.75 * vmem_cap)       # ~96 MiB on 128 MiB parts, ~48 v7x
    # Live f32 bytes per lane column: ~6 (Kp, TN) temporaries (dist / masked /
    # onehot + headroom) + double-buffered x & quant blocks + idx blocks.
    per_lane = 24 * Kp + 16 * D + 8
    hw_ceil = _round_up(HW, 128)
    if tile_hw is None:
        tile_hw = 32768                     # ~0.5-1 MB HBM per grid step @ D=4
    tile_hw = min(tile_hw, int(0.6 * vmem_limit) // per_lane, hw_ceil)
    tile_hw = max(128, (tile_hw // 128) * 128)

    n_tiles = -(-HW // tile_hw)             # cdiv
    hw_pad = n_tiles * tile_hw
    needs_mask = hw_pad != HW

    # --- input layout: NCHW consumed directly as (B, D, H*W); no transpose --
    x3 = x_nchw.reshape(B, D, HW).astype(jnp.float32)
    if needs_mask:
        x3 = jnp.pad(x3, ((0, 0), (0, 0), (0, hw_pad - HW)))

    kernel = functools.partial(_vq_kernel, HW, tile_hw, needs_mask)

    out_shapes = (
        jax.ShapeDtypeStruct((B, D, hw_pad), jnp.float32),          # quantized
        jax.ShapeDtypeStruct((B, 1, hw_pad), jnp.int32),            # indices
        jax.ShapeDtypeStruct((B * n_tiles, 1, 1), jnp.float32),     # sq-err parts
        jax.ShapeDtypeStruct((B * n_tiles, Kp, 1), jnp.float32),    # count parts
    )

    quant3, idx3, sqerr_parts, cnt_parts = pl.pallas_call(
        kernel,
        out_shape=out_shapes,
        grid_spec=pltpu.PrefetchScalarGridSpec(
            num_scalar_prefetch=0,
            grid=(B, n_tiles),
            in_specs=[
                pl.BlockSpec((None, D, tile_hw), lambda b, i: (b, 0, i)),  # x
                pl.BlockSpec((Kp, D), lambda b, i: (0, 0)),        # -2 * codebook
                pl.BlockSpec((Kp, 1), lambda b, i: (0, 0)),        # ||e||^2
                pl.BlockSpec((D, Kp), lambda b, i: (0, 0)),        # codebook^T
            ],
            out_specs=[
                pl.BlockSpec((None, D, tile_hw), lambda b, i: (b, 0, i)),
                pl.BlockSpec((None, 1, tile_hw), lambda b, i: (b, 0, i)),
                pl.BlockSpec((1, 1, 1), lambda b, i: (b * n_tiles + i, 0, 0)),
                pl.BlockSpec((1, Kp, 1), lambda b, i: (b * n_tiles + i, 0, 0)),
            ],
        ),
        compiler_params=pltpu.CompilerParams(
            # Both axes independent; the B axis keeps both v7x TensorCores
            # busy even when n_tiles == 1.
            dimension_semantics=("parallel", "parallel"),
            vmem_limit_bytes=vmem_limit),
    )(x3, en2, e2, e_t)

    # Reduce per-tile partials.
    sqerr = jnp.sum(sqerr_parts)
    counts = jnp.sum(cnt_parts, axis=0)[:K, 0]                      # (K,)

    # Forward values of q_latent_loss and e_latent_loss are identical (detach
    # only affects gradients): loss = (1 + beta) * MSE(quantized, inputs).
    mse = sqerr / (N * D)
    loss = (1.0 + commitment_cost) * mse

    # Straight-through estimator: inputs + (quantized - inputs) == quantized
    # in value.  (B, D, H*W) -> NCHW is a free reshape.
    if needs_mask:
        quant3 = quant3[:, :, :HW]
    quantized_nchw = quant3.reshape(B, D, H, W).astype(x_nchw.dtype)

    avg_probs = counts / N
    perplexity = jnp.exp(-jnp.sum(avg_probs * jnp.log(avg_probs + 1e-10)))

    indices = idx3[:, 0, :HW].reshape(N, 1)
    return loss, quantized_nchw, perplexity, indices


def _reference_forward(x_nchw, embedding, commitment_cost):
    """Pure-JAX reference mirroring the PyTorch forward (for verification)."""
    B, C, H, W = x_nchw.shape
    K, D = embedding.shape
    inputs = jnp.transpose(x_nchw, (0, 2, 3, 1))
    flat = inputs.reshape(-1, D)
    dist = (jnp.sum(flat ** 2, axis=1, keepdims=True)
            + jnp.sum(embedding ** 2, axis=1)
            - 2.0 * flat @ embedding.T)
    idx = jnp.argmin(dist, axis=1)
    enc = jax.nn.one_hot(idx, K, dtype=jnp.float32)
    quant = (enc @ embedding).reshape(inputs.shape)
    e_loss = jnp.mean((quant - inputs) ** 2)
    q_loss = jnp.mean((quant - inputs) ** 2)
    loss = q_loss + commitment_cost * e_loss
    avg_probs = jnp.mean(enc, axis=0)
    perplexity = jnp.exp(-jnp.sum(avg_probs * jnp.log(avg_probs + 1e-10)))
    return loss, jnp.transpose(quant, (0, 3, 1, 2)), perplexity, idx[:, None]


if __name__ == "__main__":
    # Module hyper-parameters (synthetic, deterministic).
    num_embeddings = 8
    embedding_dim = 4
    commitment_cost = 0.25

    key = jax.random.PRNGKey(0)
    k_emb, k_x = jax.random.split(key)

    # nn.Embedding weight init: uniform(-1/K, 1/K), shape (K, D).
    embedding = jax.random.uniform(
        k_emb, (num_embeddings, embedding_dim),
        minval=-1.0 / num_embeddings, maxval=1.0 / num_embeddings,
        dtype=jnp.float32)

    # Example encoder output, NCHW with C == embedding_dim.
    x = jax.random.normal(k_x, (2, embedding_dim, 16, 16), dtype=jnp.float32)

    loss, quantized, perplexity, indices = vector_quantizer_forward(
        x, embedding, commitment_cost=commitment_cost)
    jax.block_until_ready((loss, quantized, perplexity, indices))

    # Sanity check vs pure-JAX reference.
    r_loss, r_quant, r_perp, r_idx = _reference_forward(x, embedding,
                                                        commitment_cost)
    assert jnp.allclose(loss, r_loss, atol=1e-5), (loss, r_loss)
    assert jnp.allclose(quantized, r_quant, atol=1e-5)
    assert jnp.allclose(perplexity, r_perp, atol=1e-5)
    assert jnp.array_equal(indices.astype(jnp.int32), r_idx.astype(jnp.int32))

    print("KERNEL_OK")
</pallas_src>

<mosaic_0001>
module attributes {stable_mosaic.version = 11 : i64} {
  func.func @_vq_kernel(%arg0: i32, %arg1: i32, %arg2: memref<1x4x256xf32, #tpu.memory_space<vmem>>, %arg3: memref<8x4xf32, #tpu.memory_space<vmem>>, %arg4: memref<8x1xf32, #tpu.memory_space<vmem>>, %arg5: memref<4x8xf32, #tpu.memory_space<vmem>>, %arg6: memref<1x4x256xf32, #tpu.memory_space<vmem>>, %arg7: memref<1x1x256xi32, #tpu.memory_space<vmem>>, %arg8: memref<1x1x1xf32, #tpu.memory_space<vmem>>, %arg9: memref<1x8x1xf32, #tpu.memory_space<vmem>>) attributes {dimension_semantics = [#tpu.dimension_semantics<parallel>, #tpu.dimension_semantics<parallel>], iteration_bounds = array<i64: 2, 1>, scalar_prefetch = 0 : i64, scratch_operands = 0 : i64, tpu.core_type = #tpu.core_type<tc>, window_params = [{transform_indices = @transform_0, window_bounds = array<i64: 1, 4, 256>}, {pipeline_mode = #tpu.pipeline_mode<synchronous>, transform_indices = @transform_1, window_bounds = array<i64: 8, 4>}, {pipeline_mode = #tpu.pipeline_mode<synchronous>, transform_indices = @transform_2, window_bounds = array<i64: 8, 1>}, {pipeline_mode = #tpu.pipeline_mode<synchronous>, transform_indices = @transform_3, window_bounds = array<i64: 4, 8>}, {transform_indices = @transform_4, window_bounds = array<i64: 1, 4, 256>}, {transform_indices = @transform_5, window_bounds = array<i64: 1, 1, 256>}, {transform_indices = @transform_6, window_bounds = array<i64: 1, 1, 1>}, {transform_indices = @transform_7, window_bounds = array<i64: 1, 8, 1>}]} {
    %c0 = arith.constant 0 : index
    %c0_0 = arith.constant 0 : index
    %c0_1 = arith.constant 0 : index
    %0 = vector.load %arg2[%c0, %c0_0, %c0_1] : memref<1x4x256xf32, #tpu.memory_space<vmem>>, vector<1x4x256xf32>
    %1 = vector.shape_cast %0 : vector<1x4x256xf32> to vector<4x256xf32>
    %c0_2 = arith.constant 0 : index
    %c0_3 = arith.constant 0 : index
    %2 = vector.load %arg4[%c0_2, %c0_3] : memref<8x1xf32, #tpu.memory_space<vmem>>, vector<8x1xf32>
    %c0_4 = arith.constant 0 : index
    %c0_5 = arith.constant 0 : index
    %3 = vector.load %arg3[%c0_4, %c0_5] : memref<8x4xf32, #tpu.memory_space<vmem>>, vector<8x4xf32>
    %cst = arith.constant dense<0.000000e+00> : vector<8x256xf32>
    %4 = tpu.matmul %3, %1, %cst {dimension_numbers = #tpu.dot_dimension_numbers<[1], [0], [0], [1], [0, 0, 1, 1], [], []>} : vector<8x4xf32>, vector<4x256xf32>, vector<8x256xf32> -> vector<8x256xf32>
    %5 = vector.broadcast %2 : vector<8x1xf32> to vector<8x256xf32>
    %6 = arith.addf %5, %4 : vector<8x256xf32>
    %cst_6 = arith.constant dense<0x7F800000> : vector<256xf32>
    %7 = vector.multi_reduction <minimumf>, %6, %cst_6 [0] : vector<8x256xf32> to vector<256xf32>
    %8 = vector.shape_cast %7 : vector<256xf32> to vector<1x256xf32>
    %9 = tpu.iota {dimensions = array<i32: 0>} : vector<8x1xi32>
    %10 = arith.sitofp %9 : vector<8x1xi32> to vector<8x1xf32>
    %11 = vector.broadcast %8 : vector<1x256xf32> to vector<8x256xf32>
    %12 = arith.cmpf oeq, %6, %11 : vector<8x256xf32>
    %cst_7 = arith.constant 8.000000e+00 : f32
    %13 = vector.shape_cast %10 : vector<8x1xf32> to vector<8x1xf32>
    %14 = vector.broadcast %13 : vector<8x1xf32> to vector<8x256xf32>
    %15 = vector.broadcast %cst_7 : f32 to vector<8x256xf32>
    %16 = arith.select %12, %14, %15 : vector<8x256xi1>, vector<8x256xf32>
    %cst_8 = arith.constant dense<0x7F800000> : vector<256xf32>
    %17 = vector.multi_reduction <minimumf>, %16, %cst_8 [0] : vector<8x256xf32> to vector<256xf32>
    %18 = vector.shape_cast %17 : vector<256xf32> to vector<1x256xf32>
    %19 = arith.fptosi %18 : vector<1x256xf32> to vector<1x256xi32>
    %c0_9 = arith.constant 0 : index
    %c0_10 = arith.constant 0 : index
    %c0_11 = arith.constant 0 : index
    %20 = vector.load %arg7[%c0_9, %c0_10, %c0_11] : memref<1x1x256xi32, #tpu.memory_space<vmem>>, vector<1x1x256xi32>
    %21 = vector.shape_cast %20 : vector<1x1x256xi32> to vector<1x256xi32>
    %22 = vector.shape_cast %19 : vector<1x256xi32> to vector<1x1x256xi32>
    tpu.vector_store %arg7[%c0_9, %c0_10, %c0_11], %22 {strides = array<i32>} : memref<1x1x256xi32, #tpu.memory_space<vmem>>, vector<1x1x256xi32>,
    %23 = vector.broadcast %10 : vector<8x1xf32> to vector<8x256xf32>
    %24 = vector.broadcast %18 : vector<1x256xf32> to vector<8x256xf32>
    %25 = arith.cmpf oeq, %23, %24 : vector<8x256xf32>
    %26 = arith.extui %25 : vector<8x256xi1> to vector<8x256xi32>
    %27 = arith.sitofp %26 : vector<8x256xi32> to vector<8x256xf32>
    %c0_12 = arith.constant 0 : index
    %c0_13 = arith.constant 0 : index
    %28 = vector.load %arg5[%c0_12, %c0_13] : memref<4x8xf32, #tpu.memory_space<vmem>>, vector<4x8xf32>
    %cst_14 = arith.constant dense<0.000000e+00> : vector<4x256xf32>
    %29 = tpu.matmul %28, %27, %cst_14 {dimension_numbers = #tpu.dot_dimension_numbers<[1], [0], [0], [1], [0, 0, 1, 1], [], []>} : vector<4x8xf32>, vector<8x256xf32>, vector<4x256xf32> -> vector<4x256xf32>
    %c0_15 = arith.constant 0 : index
    %c0_16 = arith.constant 0 : index
    %c0_17 = arith.constant 0 : index
    %30 = vector.load %arg6[%c0_15, %c0_16, %c0_17] : memref<1x4x256xf32, #tpu.memory_space<vmem>>, vector<1x4x256xf32>
    %31 = vector.shape_cast %30 : vector<1x4x256xf32> to vector<4x256xf32>
    %32 = vector.shape_cast %29 : vector<4x256xf32> to vector<1x4x256xf32>
    tpu.vector_store %arg6[%c0_15, %c0_16, %c0_17], %32 {strides = array<i32>} : memref<1x4x256xf32, #tpu.memory_space<vmem>>, vector<1x4x256xf32>,
    %33 = arith.subf %29, %1 : vector<4x256xf32>
    %34 = arith.mulf %33, %33 : vector<4x256xf32>
    %cst_18 = arith.constant dense<0.000000e+00> : vector<4xf32>
    %35 = vector.multi_reduction <add>, %34, %cst_18 [1] : vector<4x256xf32> to vector<4xf32>
    %36 = vector.shape_cast %35 : vector<4xf32> to vector<4x1xf32>
    %cst_19 = arith.constant dense<0.000000e+00> : vector<1xf32>
    %37 = vector.multi_reduction <add>, %36, %cst_19 [0] : vector<4x1xf32> to vector<1xf32>
    %38 = vector.shape_cast %37 : vector<1xf32> to vector<1x1xf32>
    %39 = vector.shape_cast %38 : vector<1x1xf32> to vector<1x1x1xf32>
    %c0_20 = arith.constant 0 : index
    %c0_21 = arith.constant 0 : index
    %c0_22 = arith.constant 0 : index
    %40 = vector.load %arg8[%c0_20, %c0_21, %c0_22] : memref<1x1x1xf32, #tpu.memory_space<vmem>>, vector<1x1x1xf32>
    tpu.vector_store %arg8[%c0_20, %c0_21, %c0_22], %39 {strides = array<i32>} : memref<1x1x1xf32, #tpu.memory_space<vmem>>, vector<1x1x1xf32>,
    %cst_23 = arith.constant dense<0.000000e+00> : vector<8xf32>
    %41 = vector.multi_reduction <add>, %27, %cst_23 [1] : vector<8x256xf32> to vector<8xf32>
    %42 = vector.shape_cast %41 : vector<8xf32> to vector<8x1xf32>
    %43 = vector.shape_cast %42 : vector<8x1xf32> to vector<1x8x1xf32>
    %c0_24 = arith.constant 0 : index
    %c0_25 = arith.constant 0 : index
    %c0_26 = arith.constant 0 : index
    %44 = vector.load %arg9[%c0_24, %c0_25, %c0_26] : memref<1x8x1xf32, #tpu.memory_space<vmem>>, vector<1x8x1xf32>
    tpu.vector_store %arg9[%c0_24, %c0_25, %c0_26], %43 {strides = array<i32>} : memref<1x8x1xf32, #tpu.memory_space<vmem>>, vector<1x8x1xf32>,
    return
  }
  func.func @transform_0(%arg0: i32, %arg1: i32) -> (i32, i32, i32) {
    %c0_i32 = arith.constant 0 : i32
    %c0_i32_0 = arith.constant 0 : i32
    return %arg0, %c0_i32, %arg1 : i32, i32, i32
  }
  func.func @transform_1(%arg0: i32, %arg1: i32) -> (i32, i32) {
    %c0_i32 = arith.constant 0 : i32
    %c0_i32_0 = arith.constant 0 : i32
    %c0_i32_1 = arith.constant 0 : i32
    return %c0_i32, %c0_i32_0 : i32, i32
  }
  func.func @transform_2(%arg0: i32, %arg1: i32) -> (i32, i32) {
    %c0_i32 = arith.constant 0 : i32
    %c0_i32_0 = arith.constant 0 : i32
    %c0_i32_1 = arith.constant 0 : i32
    return %c0_i32, %c0_i32_0 : i32, i32
  }
  func.func @transform_3(%arg0: i32, %arg1: i32) -> (i32, i32) {
    %c0_i32 = arith.constant 0 : i32
    %c0_i32_0 = arith.constant 0 : i32
    %c0_i32_1 = arith.constant 0 : i32
    return %c0_i32, %c0_i32_0 : i32, i32
  }
  func.func @transform_4(%arg0: i32, %arg1: i32) -> (i32, i32, i32) {
    %c0_i32 = arith.constant 0 : i32
    %c0_i32_0 = arith.constant 0 : i32
    return %arg0, %c0_i32, %arg1 : i32, i32, i32
  }
  func.func @transform_5(%arg0: i32, %arg1: i32) -> (i32, i32, i32) {
    %c0_i32 = arith.constant 0 : i32
    %c0_i32_0 = arith.constant 0 : i32
    return %arg0, %c0_i32, %arg1 : i32, i32, i32
  }
  func.func @transform_6(%arg0: i32, %arg1: i32) -> (i32, i32, i32) {
    %c1_i32 = arith.constant 1 : i32
    %0 = arith.muli %arg0, %c1_i32 : i32
    %1 = arith.addi %0, %arg1 : i32
    %c0_i32 = arith.constant 0 : i32
    %c0_i32_0 = arith.constant 0 : i32
    %c0_i32_1 = arith.constant 0 : i32
    return %1, %c0_i32, %c0_i32_0 : i32, i32, i32
  }
  func.func @transform_7(%arg0: i32, %arg1: i32) -> (i32, i32, i32) {
    %c1_i32 = arith.constant 1 : i32
    %0 = arith.muli %arg0, %c1_i32 : i32
    %1 = arith.addi %0, %arg1 : i32
    %c0_i32 = arith.constant 0 : i32
    %c0_i32_0 = arith.constant 0 : i32
    %c0_i32_1 = arith.constant 0 : i32
    return %1, %c0_i32, %c0_i32_0 : i32, i32, i32
  }
}

</mosaic_0001>

<bundles_post_ra>
// kernel: vector_quantizer_forward.1
= control target key start
LH: loop header
LB: loop body
LE: loop exit
PB: predicated region body
PF: predicated region fallthrough
CT: control target
= control target key end

     0   :  { %13 = vsyncpa [#allocation3], 0  ;;  %s1194_s0 = inlined_call_operand.vmem [shape: f32[2,4,256], index: 0, kind: input, shape index: {}]   ;;  %s1195_s1 = inlined_call_operand.vmem [shape: f32[8,4], index: 1, kind: input, shape index: {}]   ;;  %s1196_s2 = inlined_call_operand.vmem [shape: f32[8,1], index: 2, kind: input, shape index: {}]   ;;  %s1197_s3 = inlined_call_operand.vmem [shape: f32[4,8], index: 3, kind: input, shape index: {}]   ;;  %s1198_s4 = inlined_call_operand.vmem [shape: f32[2,4,256], index: 4, kind: output, shape index: {0}]   ;;  %s1199_s5 = inlined_call_operand.hbm [shape: s32[2,1,256], index: 5, kind: output, shape index: {1}]   ;;  %s1200_s6 = inlined_call_operand.vmem [shape: f32[2,1,1], index: 6, kind: output, shape index: {2}]   ;;  %s1201_s7 = inlined_call_operand.vmem [shape: f32[2,8,1], index: 7, kind: output, shape index: {3}]  }
   0x1   :  { %15 = vsyncpa [#allocation3 + $0x1], 0  ;;  %s1038_s24 = smov 0   ;;  %s1040_s25 = smov 0  }
   0x2   :  { %s1042_s26 = smov 0   ;;  %s1044_s27 = smov 0  }
   0x3   :  { %s1046_s28 = smov 0   ;;  %s1048_s29 = smov 0  }
   0x4 LB: > { %s821_s30 = sadd.s32 4294967295, %s991_s29   ;;  %s822_s8 = sadd.s32 4294967294, %s991_s29   ;;  %s991_s29 = sphi %s1048_s29, %s21_s29   ;;  %s987_s28 = sphi %s1046_s28, %s1208_s28   ;;  %s983_s27 = sphi %s1044_s27, %s1207_s27   ;;  %s979_s26 = sphi %s1042_s26, %s1206_s26   ;;  %s975_s25 = sphi %s1040_s25, %s1205_s25   ;;  %s971_s24 = sphi %s1038_s24, %s1204_s24  }
   0x5   : > { %s33_s9 = sadd.s32 1, %s987_s28  ;;  %s161_s10 = sadd.s32 1, %s979_s26 }
   0x6   : > { %p35_p0 = scmp.ge.s32.totalorder %s33_s9, 2  ;;  %p171_p1 = scmp.ne.s32.totalorder %s979_s26, %s975_s25 }
   0x7   : > { %p172_p2 = scmp.eq.s32.totalorder %s821_s30, 1  ;;  %p177_p3 = scmp.ne.s32.totalorder %s975_s25, %s971_s24 }
   0x8   : > { %s1210_s9 = smov (%p35_p0, %s33_s9), 0  ;;  %p178_p5 = scmp.eq.s32.totalorder %s822_s8, 1 }
   0x9   : > { %p1078_p4 = por %p172_p2, %p171_p1  ;;  %s156_s12 = ssub.s32 %s987_s28, %s1210_s9 }
   0xa   : > { %p825_p6 = scmp.ge.s32.totalorder %s991_s29, 1  ;;  %p159_p7 = scmp.eq.s32.totalorder %s156_s12, 0 }
   0xb   : > { %p1085_p8 = por %p178_p5, %p177_p3  ;;  %p274_p9 = scmp.lt.s32.totalorder %s991_s29, 3 }
   0xc   : > { %s1091_s14 = scalar_select %p159_p7, %s979_s26, %s161_s10  }
   0xd   : > { %p275_p10 = pnand %p825_p6, %p274_p9 }
   0xe   : > { %p329_p11 = scmp.lt.s32.totalorder (!%p275_p10), %s983_s27, 1  ;;  %v993_v0 = vmov (!%p275_p10), 0.0   ;;  %v994_v1 = vmov (!%p275_p10), 0   ;;  %v361_v2 = vld [vmem:[%s1196_s2] sm:$0xff] (!%p275_p10)  ;;  %vm369_vm0 = vcmask (!%p275_p10), 1043456   ;;  %vm365_vm1 = vcmask (!%p275_p10), 31744  }
   0xf   : > { %278 = sbr.rel (%p275_p10) target bundleno = 651 (0x28b), region = 36  ;;  %438 = vmatprep.mubr.f32.mxu0 (!%p275_p10), %v993_v0  ;;  %911 = vset.pattern.permute.xlu0 (!%p275_p10), %v994_v1  ;;  %v362_v5 = vld [vmem:[%s1195_s1] sm:$0xff] (!%p275_p10)  ;;  %v464_v12 = vlaneseq (!%p275_p10)  ;;  %v995_v36 = vmov (!%p275_p10), 1966171168   ;;  %vm512_vm6 = vcmask (!%p275_p10), 64512   ;;  %v996_v47 = vmov (!%p275_p10), 1.0  }
  0x10   : > { %447 = vperm.xlu0 (!%p275_p10), %911, %v361_v2   ;;  %580 = vmatprep.mubr.f32.mxu1 (!%p275_p10), %v993_v0  ;;  %v487_v37 = vunpack.c.l.s4 (!%p275_p10), %v995_v36  ;;  %v511_v45 = vld [vmem:[%s1197_s3] sm:$0xf] (!%p275_p10)  ;;  %s312_s10 = sand.u32 (!%p275_p10), 1, %s975_s25   ;;  %vm614_vm8 = vcmask (!%p275_p10), 7168   ;;  %s847_s30 = sshll.u32 (!%p275_p10), %s983_s27, 5 }
  0x11   : > { %v465_v17 = vshrl.u32 (!%p275_p10), %v464_v12, 7  ;;  %s826_s12 = sshll.u32 (!%p275_p10), %s312_s10, 1  ;;  %vm502_vm7 = vcmp.lt.s32.totalorder (!%p275_p10), %v464_v12, 256  ;;  %s626_s19 = scalar_lea.sflag (!%p275_p10), [#allocation3], %s312_s10 }
  0x12   : > { %v488_v42 = vunpack.c.0.s8 (!%p275_p10), %v487_v37  ;;  %s314_s15 = scalar_lea.vmem (!%p275_p10), [#allocation2], %s826_s12 }
  0x13   : > { %v466_v22 = vcvt.s32.f32 (!%p275_p10), %v465_v17  ;;  %s655_s8 = sshll.u32 (!%p275_p10), %s314_s15, 4  ;;  %s656_s8 = int_to_ptr.vmem [resolvable:$true] %s655_s8 }
  0x14   : > { %v491_v52 = vsub.s32 (!%p275_p10), %v488_v42, %v465_v17 }
  0x16   : > { %s1099_s17 = scalar_select %p329_p11, %s983_s27, 1 }
  0x18   : > { %s1103_s18 = sshll.u32 %s1099_s17, 3 }
  0x19   : > { %s336_s21 = scalar_lea.vmem %s1194_s0, %s1103_s18  ;;  %s358_s20 = scalar_lea.vmem %s1201_s7, %s1103_s18 }
  0x1a   : > { %v1109_v3 = vld [vmem:[%s336_s21] sm:$0xff]  ;;  %s346_s23 = scalar_lea.vmem %s1198_s4, %s1103_s18  ;;  %s1146_s18 = scalar_lea.hbm %s1199_s5, %s847_s30 }
  0x1b   : > { %v1113_v4 = vcombine.high %v1109_v3, %v1109_v3  ;;  %s997_s21 = smov [#allocation2]  }
  0x1c   : > { %s917_s22 = sshll.u32 %s997_s21, 4  ;;  %s918_s22 = int_to_ptr.vmem [resolvable:$false] %s917_s22 }
  0x1d   : > { %832 = vmatprep.subr.msk.mxu0 %vm369_vm0, %v1113_v4  ;;  %p920_p1 = scmp.lt.s32.totalorder %s656_s8, %s918_s22 }
  0x1e   : > { %833 = vmatpush1.msk.msra.mxu0 %vm369_vm0, %v1109_v3 }
  0x1f   : > { %834 = vmatmul.mubr.msk.f32.vlgmr.msra.gmra.mrb[0].mxu0 %vm365_vm1, %v362_v5 }
  0x8f   : > { %v448_v6 = vpop.permute.xlu0 %447 }
  0xf2   : > { %v440_v7 = vpop.f32.mrb[0].mxu0 }
  0xf3   : > { %v450_v8 = vadd.f32 %v448_v6, %v440_v7  ;;  %v442_v9 = vpop.f32.mrb[1].mxu0 }
  0xf4   : > { %v451_v10 = vadd.f32 %v448_v6, %v442_v9 }
  0xf5   : > { %v452_v11 = vrot.slane %v450_v8, 4 }
  0xf6   : > { %v458_v13 = vrot.slane %v451_v10, 4 }
  0xf7   : > { %v453_v14 = vmin.f32 %v450_v8, %v452_v11 }
  0xf8   : > { %v459_v15 = vmin.f32 %v451_v10, %v458_v13 }
  0xf9   : > { %v454_v16 = vrot.slane %v453_v14, 2 }
  0xfa   : > { %v460_v18 = vrot.slane %v459_v15, 2 }
  0xfb   : > { %v455_v19 = vmin.f32 %v453_v14, %v454_v16 }
  0xfc   : > { %v461_v20 = vmin.f32 %v459_v15, %v460_v18 }
  0xfd   : > { %v456_v21 = vrot.slane %v455_v19, 1 }
  0xfe   : > { %v462_v23 = vrot.slane %v461_v20, 1 }
  0xff   : > { %v457_v24 = vmin.f32 %v455_v19, %v456_v21 }
 0x100   : > { %v463_v25 = vmin.f32 %v461_v20, %v462_v23 }
 0x101   : > { %vm467_vm2 = vcmp.eq.f32.partialorder %v450_v8, %v457_v24 }
 0x102   : > { %v469_v26 = vsel %vm467_vm2, %v466_v22, 8.0  ;;  %vm468_vm3 = vcmp.eq.f32.partialorder %v451_v10, %v463_v25 }
 0x103   : > { %v471_v27 = vrot.slane %v469_v26, 4  ;;  %v470_v28 = vsel %vm468_vm3, %v466_v22, 8.0 }
 0x104   : > { %v477_v29 = vrot.slane %v470_v28, 4 }
 0x105   : > { %v472_v30 = vmin.f32 %v469_v26, %v471_v27 }
 0x106   : > { %v478_v31 = vmin.f32 %v470_v28, %v477_v29 }
 0x107   : > { %v473_v32 = vrot.slane %v472_v30, 2 }
 0x108   : > { %v479_v33 = vrot.slane %v478_v31, 2 }
 0x109   : > { %v474_v34 = vmin.f32 %v472_v30, %v473_v32 }
 0x10a   : > { %v480_v35 = vmin.f32 %v478_v31, %v479_v33 }
 0x10b   : > { %v475_v38 = vrot.slane %v474_v34, 1 }
 0x10c   : > { %v481_v39 = vrot.slane %v480_v35, 1 }
 0x10d   : > { %v476_v40 = vmin.f32 %v474_v34, %v475_v38 }
 0x10e   : > { %v482_v41 = vmin.f32 %v480_v35, %v481_v39 }
 0x10f   : > { %v848_v43 = vtrunc.f32 %v476_v40  ;;  %vm505_vm4 = vcmp.eq.f32.partialorder %v466_v22, %v476_v40 }
 0x110   : > { %v850_v44 = vtrunc.f32 %v482_v41  ;;  %vm506_vm5 = vcmp.eq.f32.partialorder %v466_v22, %v482_v41  ;;  %v835_v46 = vsel %vm505_vm4, 1.0, %v993_v0 }
 0x111   : > { %837 = vmatprep.subr.msk.mxu1 %vm506_vm5, %v996_v47  ;;  %v849_v48 = vcvt.f32.s32 %v848_v43  ;;  %v836_v49 = vsel %vm506_vm5, 1.0, %v993_v0 }
 0x112   : > { %v851_v50 = vcvt.f32.s32 %v850_v44  ;;  %838 = vmatpush1.msk.msra.mxu1 %vm505_vm4, %v996_v47  ;;  %v611_v51 = vadd.f32 %v836_v49, %v835_v46 }
 0x113   : > { %839 = vmatmul.mubr.msk.f32.vlgmr.msra.gmra.mrb[0].mxu1 %vm512_vm6, %v511_v45 }
 0x114   : > { %v485_v53 = vcombine.low %v849_v48, %v851_v50  ;;  %612 = vadd.xlane.f32.xlu1 %v611_v51 }
 0x116   : > { %v492_v54 = vrot.slane %v485_v53, %v491_v52 }
 0x118   : > { %v499_v55 = vrot.slane %v492_v54, %v491_v52 }
 0x11a   : > { %504 = vst.msk [vmem:[%s314_s15] sm:$0x3] %vm502_vm7, %v499_v55 }
 0x1a1   : > { %v613_v56 = vpop.xlane.xlu1 %612 }
 0x1a2   : > { %615 = vst.msk [vmem:[%s358_s20] sm:$0xff] %vm614_vm8, %v613_v56  ;;  %s913_s20 = scalar_lea.vmem %s656_s8, 32 }
 0x1a3   : > { %p914_p12 = scmp.ne.s32.totalorder %s656_s8, %s913_s20 }
 0x1a5   : > { %p915_p13 = pnand %p914_p12, %p1078_p4 }
 0x1a7   : > { %p916_p0 = pneg %p915_p13 }
 0x1e6   : > { %v582_v57 = vpop.f32.mrb[0].mxu1 }
 0x1e7   : > { %v593_v58 = vsub.f32 %v582_v57, %v1109_v3  ;;  %v584_v59 = vpop.f32.mrb[1].mxu1 }
 0x1e8   : > { %v589_v60 = vcombine.low %v582_v57, %v584_v59  ;;  %v594_v61 = vsub.f32 %v584_v59, %v1113_v4 }
 0x1e9   : > { %v595_v62 = vmul.f32 %v593_v58, %v593_v58 }
 0x1ea   : > { %591 = vst [vmem:[%s346_s23] sm:$0xff] %v589_v60  ;;  %v596_v63 = vmul.f32 %v594_v61, %v594_v61  ;;  %s919_s23 = scalar_lea.vmem %s918_s22, 64 }
 0x1eb   : > { %v597_v0 = vsel %vm369_vm0, %v595_v62, 0.0  ;;  %p921_p2 = scmp.lt.s32.totalorder %s919_s23, %s913_s20 }
 0x1ec   : > { %v598_v1 = vsel %vm369_vm0, %v596_v63, 0.0 }
 0x1ed   : > { %v599_v2 = vadd.f32 %v598_v1, %v597_v0  ;;  %p922_p3 = por %p921_p2, %p920_p1 }
 0x1ef   : > { %600 = vadd.xlane.f32.xlu0 %v599_v2  ;;  %p923_p5 = pnand %p922_p3, %p916_p0 }
 0x1f1   : > { %926 = shalt.err (!%p923_p5)
}
 0x1f2   : > { %s927_s27 = scalar_lea.hbm %s1146_s18, 32  ;;  %s931_s30 = scalar_lea.hbm %s1199_s5, 64 }
 0x1f3   : > { %p928_p6 = scmp.ne.s32.totalorder %s1146_s18, %s927_s27  ;;  %p932_p10 = scmp.lt.u32.totalorder %s1146_s18, %s1199_s5 }
 0x1f4   : > { %p933_p11 = scmp.lt.u32.totalorder %s931_s30, %s927_s27  ;;  %p935_p13 = scmp.lt.u32.totalorder %s927_s27, %s1146_s18 }
 0x1f5   : > { %p929_p7 = pnand %p928_p6, %p1078_p4 }
 0x1f6   : > { %p934_p12 = por %p933_p11, %p932_p10 }
 0x1f7   : > { %p930_p9 = pneg %p929_p7 }
 0x1f8   : > { %p936_p0 = por %p935_p13, %p934_p12 }
 0x1fa   : > { %p937_p1 = pnand %p936_p0, %p930_p9 }
 0x1fc   : > { %940 = shalt.err (!%p937_p1)
}
 0x1fd   : > { %852 = dma.vmem_to_hbm [thread:$0]  (%p1078_p4), %s656_s8, 32, %s1146_s18, %s626_s19   ;;  %vm609_vm9 = vcmask 0  }
 0x1fe   : > { %s352_s22 = scalar_lea.vmem %s1200_s6, %s1099_s17 }
 0x27c   : > { %v601_v3 = vpop.xlane.xlu0 %600 }
 0x27d   : > { %v602_v4 = vsel %vm369_vm0, %v601_v3, 0.0 }
 0x27e   : > { %v603_v5 = vrot.slane %v602_v4, 4 }
 0x280   : > { %v604_v6 = vadd.f32 %v603_v5, %v602_v4 }
 0x282   : > { %v605_v7 = vrot.slane %v604_v6, 2 }
 0x284   : > { %v606_v8 = vadd.f32 %v605_v7, %v604_v6 }
 0x286   : > { %v607_v9 = vrot.slane %v606_v8, 1 }
 0x288   : > { %v608_v10 = vadd.f32 %v607_v9, %v606_v8 }
 0x28a   : > { %610 = vst.msk [vmem:[%s352_s22] sm:$0x1] %vm609_vm9, %v608_v10 }
 0x28b PF: > { %p858_p4 = scmp.ge.s32.totalorder %s991_s29, 2  ;;  %s687_s11 = sand.u32 1, %s971_s24  }
 0x28c   : > { %s688_s8 = scalar_lea.sflag [#allocation3], %s687_s11 }
 0x28d   : > { %p855_p2 = pnand %p858_p4, %p1085_p8 }
 0x28f   : > { %966 = dma.done.wait (!%p855_p2), %s688_s8, 32  }
 0x290   : > { %968 = vsyncadd (!%p855_p2), %s688_s8, 4294967264  ;;  %s21_s29 = sadd.s32 1, %s991_s29   ;;  %s1204_s24 = smov %s975_s25 }
 0x291   : > { %p18_p3 = scmp.ge.s32.totalorder %s21_s29, 4   ;;  %s1205_s25 = smov %s979_s26 }
 0x292   : > { %s1206_s26 = smov %s1091_s14  ;;  %s1207_s27 = smov %s987_s28 }
 0x293   : > { %s1208_s28 = smov %s1210_s9  ;;  %20 = sbr.rel (!%p18_p3) target bundleno = 4 (0x4), region = 107 }
 0x29a   :  { %708 = vsyncpa [#allocation3], 1 }
 0x29b   :  { %710 = vsyncpa [#allocation3 + $0x1], 1 }

</bundles_post_ra>
